<compile_context>
chip_gen: v6e
topology: v6e:2x2x1
jax: 0.10.0
libtpu: 0.0.40
codegen_flags: <defaults>
</compile_context>

<pallas_src>
import functools
import math

import jax
import jax.numpy as jnp
from jax import lax
from jax.experimental import pallas as pl
from jax.experimental.pallas import tpu as pltpu


_VMEM_SPEC = pl.BlockSpec(memory_space=pltpu.MemorySpace.VMEM)
_SMEM_SPEC = pl.BlockSpec(memory_space=pltpu.MemorySpace.SMEM)


# ---------------------------------------------------------------------------
# Single forward pass:  f(x) = tanh(x @ W1 + b1) @ W2 + b2
# ---------------------------------------------------------------------------
def _ode_func_kernel(x_ref, w1_ref, b1_ref, w2_ref, b2_ref, o_ref):
    # bf16 MXU operands, f32 accumulation; all elementwise math (bias add, tanh)
    # stays in f32 so the VPU/EUP path is identical on v5e/v6e/v7x.
    x_bf = x_ref[...].astype(jnp.bfloat16)
    h = jnp.tanh(
        jnp.dot(x_bf, w1_ref[...], preferred_element_type=jnp.float32)
        + b1_ref[...]
    )
    o = (
        jnp.dot(h.astype(jnp.bfloat16), w2_ref[...],
                preferred_element_type=jnp.float32)
        + b2_ref[...]
    )
    o_ref[...] = o.astype(o_ref.dtype)


def _cast_params(params):
    """Weights -> bf16 for the MXU, biases stay f32 for the VPU add."""
    w1, b1, w2, b2 = params
    return (
        w1.astype(jnp.bfloat16),
        b1.astype(jnp.float32),
        w2.astype(jnp.bfloat16),
        b2.astype(jnp.float32),
    )


def ode_func_forward(t, x, params):
    """Forward pass of ODEFunc. `t` is ignored (matches the PyTorch module)."""
    del t
    w1, b1, w2, b2 = _cast_params(params)
    batch, num_basis = x.shape
    hidden_dim = w1.shape[1]

    bytes_accessed = (
        sum(int(a.size) * a.dtype.itemsize for a in (x, w1, b1, w2, b2))
        + batch * num_basis * x.dtype.itemsize
    )
    cost = pl.CostEstimate(
        flops=2 * batch * num_basis * hidden_dim * 2,  # two matmuls
        transcendentals=batch * hidden_dim,            # tanh
        bytes_accessed=bytes_accessed,
    )

    return pl.pallas_call(
        _ode_func_kernel,
        out_shape=jax.ShapeDtypeStruct((batch, num_basis), x.dtype),
        in_specs=[_VMEM_SPEC] * 5,
        out_specs=_VMEM_SPEC,
        cost_estimate=cost,
    )(x, w1, b1, w2, b2)


# ---------------------------------------------------------------------------
# Fused integrator: n_steps of explicit Euler inside ONE pallas_call.
# Weights stay resident in VMEM; bias broadcasts are hoisted out of the loop;
# several independent trajectories are stepped together (folded into batch).
# ---------------------------------------------------------------------------
def _fused_euler_kernel(x_ref, dt_ref, w1_ref, b1_ref, w2_ref, b2_ref, o_ref,
                        *, n_steps, unroll):
    batch = x_ref.shape[0]
    w1 = w1_ref[...]                                   # bf16, loop-resident
    w2 = w2_ref[...]
    # Hoist bias broadcasts once (JAX does not CSE broadcast_in_dim per iter).
    b1 = jnp.broadcast_to(b1_ref[...], (batch, w1.shape[1]))
    b2 = jnp.broadcast_to(b2_ref[...], (batch, w2.shape[1]))
    dt = dt_ref[0]                                     # runtime scalar (SMEM)

    def f(x):
        xb = x.astype(jnp.bfloat16)
        h = jnp.tanh(jnp.dot(xb, w1, preferred_element_type=jnp.float32) + b1)
        return (
            jnp.dot(h.astype(jnp.bfloat16), w2,
                    preferred_element_type=jnp.float32)
            + b2
        )

    # State carried in f32 for the whole loop; rounded to the output dtype once.
    x0 = x_ref[...].astype(jnp.float32)

    def body(_, x):
        return x + dt * f(x)

    xN = lax.fori_loop(0, n_steps, body, x0, unroll=unroll)
    o_ref[...] = xN.astype(o_ref.dtype)


def ode_func_integrate(x, params, *, n_steps, dt, unroll=4):
    """Run `n_steps` of explicit Euler x <- x + dt * f(x) in a single kernel.

    `x` may be (batch, num_basis) or (n_systems, batch, num_basis); independent
    systems are folded into the batch axis so they fill MXU/EUP latency together.
    """
    w1, b1, w2, b2 = _cast_params(params)
    orig_shape = x.shape
    num_basis = orig_shape[-1]
    x2d = x.reshape(-1, num_basis)          # fold independent systems into batch
    batch = x2d.shape[0]
    hidden_dim = w1.shape[1]

    dt_arr = jnp.full((1,), dt, dtype=jnp.float32)
    unroll = max(1, min(int(unroll), int(n_steps)))

    bytes_accessed = (
        sum(int(a.size) * a.dtype.itemsize for a in (x2d, w1, b1, w2, b2))
        + batch * num_basis * x2d.dtype.itemsize
    )
    cost = pl.CostEstimate(
        flops=n_steps * 2 * batch * num_basis * hidden_dim * 2,
        transcendentals=n_steps * batch * hidden_dim,
        bytes_accessed=bytes_accessed,  # weights resident across all steps
    )

    kernel = functools.partial(_fused_euler_kernel, n_steps=int(n_steps),
                               unroll=unroll)
    out = pl.pallas_call(
        kernel,
        out_shape=jax.ShapeDtypeStruct((batch, num_basis), x2d.dtype),
        in_specs=[_VMEM_SPEC, _SMEM_SPEC] + [_VMEM_SPEC] * 4,
        out_specs=_VMEM_SPEC,
        input_output_aliases={0: 0},        # update the state buffer in place
        cost_estimate=cost,
    )(x2d, dt_arr, w1, b1, w2, b2)
    return out.reshape(orig_shape)


# ---------------------------------------------------------------------------
# Params + pure-JAX references
# ---------------------------------------------------------------------------
def init_params(key, num_basis, hidden_dim, dtype=jnp.float32):
    """nn.Linear-style init U(-1/sqrt(fan_in), 1/sqrt(fan_in)).

    Weights are stored as [in_features, out_features] (transposed w.r.t.
    PyTorch's [out, in]) so the kernel computes x @ W directly.
    """
    k1, k2, k3, k4 = jax.random.split(key, 4)
    bound1 = 1.0 / math.sqrt(num_basis)
    bound2 = 1.0 / math.sqrt(hidden_dim)
    w1 = jax.random.uniform(k1, (num_basis, hidden_dim), dtype, -bound1, bound1)
    b1 = jax.random.uniform(k2, (1, hidden_dim), dtype, -bound1, bound1)
    w2 = jax.random.uniform(k3, (hidden_dim, num_basis), dtype, -bound2, bound2)
    b2 = jax.random.uniform(k4, (1, num_basis), dtype, -bound2, bound2)
    return (w1, b1, w2, b2)


def ode_func_reference(t, x, params):
    """Pure-JAX reference mimicking the kernel's bf16-operand / f32-accumulate math."""
    del t
    w1, b1, w2, b2 = _cast_params(params)
    h = jnp.tanh(
        jnp.dot(x.astype(jnp.bfloat16), w1, preferred_element_type=jnp.float32)
        + b1
    )
    return (
        jnp.dot(h.astype(jnp.bfloat16), w2, preferred_element_type=jnp.float32)
        + b2
    )


def integrate_reference(x, params, *, n_steps, dt):
    x = x.astype(jnp.float32)
    for _ in range(n_steps):
        x = x + dt * ode_func_reference(0.0, x, params)
    return x


if __name__ == "__main__":
    key = jax.random.PRNGKey(0)
    k_params, k_x, k_xs = jax.random.split(key, 3)

    batch = 8
    num_basis = 32
    hidden_dim = 64

    params = init_params(k_params, num_basis, hidden_dim)
    x = jax.random.normal(k_x, (batch, num_basis), dtype=jnp.float32)
    t = jnp.float32(0.0)  # ignored, kept to match forward(t, x) signature

    # --- single forward pass (matches ODEFunc.forward) ---
    out = ode_func_forward(t, x, params)
    out = jax.block_until_ready(out)
    ref = ode_func_reference(t, x, params)
    assert out.shape == (batch, num_basis), out.shape
    assert jnp.allclose(out, ref, atol=2e-3, rtol=2e-3), "forward mismatch vs reference"

    # --- fused multi-step integration over many independent trajectories ---
    # 16 systems x 8 batch = 128 rows: fills sublanes and keeps the MXU/EUP busy.
    n_systems = 16
    xs = jax.random.normal(k_xs, (n_systems, batch, num_basis), dtype=jnp.float32)
    n_steps, dt = 16, 0.01
    xT = ode_func_integrate(xs, params, n_steps=n_steps, dt=dt, unroll=4)
    xT = jax.block_until_ready(xT)
    xT_ref = integrate_reference(
        xs.reshape(-1, num_basis), params, n_steps=n_steps, dt=dt
    ).reshape(n_systems, batch, num_basis)
    assert xT.shape == (n_systems, batch, num_basis), xT.shape
    assert jnp.allclose(xT, xT_ref, atol=5e-3, rtol=5e-3), "integrator mismatch vs reference"

    print("KERNEL_OK")
</pallas_src>

<mosaic_0001>
module attributes {stable_mosaic.version = 11 : i64} {
  func.func @_ode_func_kernel(%arg0: memref<8x32xf32, #tpu.memory_space<vmem>>, %arg1: memref<32x64xbf16, #tpu.memory_space<vmem>>, %arg2: memref<1x64xf32, #tpu.memory_space<vmem>>, %arg3: memref<64x32xbf16, #tpu.memory_space<vmem>>, %arg4: memref<1x32xf32, #tpu.memory_space<vmem>>, %arg5: memref<8x32xf32, #tpu.memory_space<vmem>>) attributes {dimension_semantics = [], scalar_prefetch = 0 : i64, scratch_operands = 0 : i64, tpu.core_type = #tpu.core_type<tc>} {
    %c0 = arith.constant 0 : index
    %c0_0 = arith.constant 0 : index
    %0 = vector.load %arg0[%c0, %c0_0] : memref<8x32xf32, #tpu.memory_space<vmem>>, vector<8x32xf32>
    %1 = arith.truncf %0 : vector<8x32xf32> to vector<8x32xbf16>
    %c0_1 = arith.constant 0 : index
    %c0_2 = arith.constant 0 : index
    %2 = vector.load %arg1[%c0_1, %c0_2] : memref<32x64xbf16, #tpu.memory_space<vmem>>, vector<32x64xbf16>
    %cst = arith.constant dense<0.000000e+00> : vector<8x64xf32>
    %3 = tpu.matmul %1, %2, %cst {dimension_numbers = #tpu.dot_dimension_numbers<[1], [0], [0], [1], [0, 0, 1, 1], [], []>} : vector<8x32xbf16>, vector<32x64xbf16>, vector<8x64xf32> -> vector<8x64xf32>
    %c0_3 = arith.constant 0 : index
    %c0_4 = arith.constant 0 : index
    %4 = vector.load %arg2[%c0_3, %c0_4] : memref<1x64xf32, #tpu.memory_space<vmem>>, vector<1x64xf32>
    %5 = vector.broadcast %4 : vector<1x64xf32> to vector<8x64xf32>
    %6 = arith.addf %3, %5 : vector<8x64xf32>
    %7 = math.tanh %6 : vector<8x64xf32>
    %8 = arith.truncf %7 : vector<8x64xf32> to vector<8x64xbf16>
    %c0_5 = arith.constant 0 : index
    %c0_6 = arith.constant 0 : index
    %9 = vector.load %arg3[%c0_5, %c0_6] : memref<64x32xbf16, #tpu.memory_space<vmem>>, vector<64x32xbf16>
    %cst_7 = arith.constant dense<0.000000e+00> : vector<8x32xf32>
    %10 = tpu.matmul %8, %9, %cst_7 {dimension_numbers = #tpu.dot_dimension_numbers<[1], [0], [0], [1], [0, 0, 1, 1], [], []>} : vector<8x64xbf16>, vector<64x32xbf16>, vector<8x32xf32> -> vector<8x32xf32>
    %c0_8 = arith.constant 0 : index
    %c0_9 = arith.constant 0 : index
    %11 = vector.load %arg4[%c0_8, %c0_9] : memref<1x32xf32, #tpu.memory_space<vmem>>, vector<1x32xf32>
    %12 = vector.broadcast %11 : vector<1x32xf32> to vector<8x32xf32>
    %13 = arith.addf %10, %12 : vector<8x32xf32>
    %c0_10 = arith.constant 0 : index
    %c0_11 = arith.constant 0 : index
    %14 = vector.load %arg5[%c0_10, %c0_11] : memref<8x32xf32, #tpu.memory_space<vmem>>, vector<8x32xf32>
    tpu.vector_store %arg5[%c0_10, %c0_11], %13 {strides = array<i32>} : memref<8x32xf32, #tpu.memory_space<vmem>>, vector<8x32xf32>,
    return
  }
}

</mosaic_0001>

<bundles_post_ra>
// kernel: tpu_custom_call.1
= control target key start
LH: loop header
LB: loop body
LE: loop exit
PB: predicated region body
PF: predicated region fallthrough
CT: control target
= control target key end

     0   :  { %v262_v1 = vmov 0.0   ;;  %vm263_vm0 = vmmov 0   ;;  %s327_s0 = inlined_call_operand.vmem [shape: f32[8,32], index: 0, kind: input, shape index: {}]   ;;  %s328_s1 = inlined_call_operand.vmem [shape: bf16[32,64], index: 1, kind: input, shape index: {}]   ;;  %s329_s2 = inlined_call_operand.vmem [shape: f32[1,64], index: 2, kind: input, shape index: {}]   ;;  %s330_s3 = inlined_call_operand.vmem [shape: bf16[64,32], index: 3, kind: input, shape index: {}]   ;;  %s331_s4 = inlined_call_operand.vmem [shape: f32[1,32], index: 4, kind: input, shape index: {}]   ;;  %s332_s5 = inlined_call_operand.hbm [shape: f32[8,32], index: 5, kind: output, shape index: {}]  }
   0x1   :  { %v232_v0 = vld [vmem:[%s328_s1 + $0x8] sm:$0xff]   ;;  %209 = vmatprep.subr.bf16.mxu0 %v262_v1  ;;  %217 = vmatprep.subr.bf16.mxu1 %v262_v1  ;;  %v233_v2 = vld [vmem:[%s328_s1] sm:$0xff]  }
   0x2   :  { %210 = vmatpush3.bf16.msra.mxu0 %v232_v0  ;;  %213 = vmatprep.mubr.msk.bf16.mxu0 %vm263_vm0, %v262_v1  ;;  %v22_v3 = vld [vmem:[%s327_s0] sm:$0xff] }
   0x3   :  { %211 = vmatprep.subr.bf16.mxu0 %v262_v1  ;;  %225 = vmatprep.mubr.msk.bf16.mxu1 %vm263_vm0, %v262_v1  ;;  %v23_v4 = vpack.c.bf16 %v22_v3, %v22_v3 }
   0x4   :  { %10 = vsyncpa [#allocation3], 0  ;;  %vm47_vm1 = vcmask 261120   ;;  %v234_v5 = vld [vmem:[%s330_s3 + $0x18] sm:$0xff]   ;;  %v235_v6 = vld [vmem:[%s330_s3 + $0x10] sm:$0xff]   ;;  %vm132_vm2 = vcmask 523264  }
   0x5   :  { %218 = vmatpush3.bf16.msra.mxu1 %v234_v5  ;;  %v236_v7 = vld [vmem:[%s330_s3 + $0x8] sm:$0xff]   ;;  %v237_v8 = vld [vmem:[%s330_s3] sm:$0xff]   ;;  %s264_s3 = smov [#allocation2]  }
   0x6   :  { %212 = vmatpush3.bf16.msra.mxu0 %v233_v2  ;;  %219 = vmatprep.subr.bf16.mxu1 %v262_v1  ;;  %v191_v9 = vld [vmem:[%s329_s2] ss:$0 sm:$0xff]  ;;  %s183_s9 = sshll.u32 %s264_s3, 4  ;;  %s184_s9 = int_to_ptr.vmem [resolvable:$true] %s183_s9 }
   0x7   :  { %v195_v17 = vld [vmem:[%s331_s4] ss:$0 sm:$0xff]  ;;  %s240_s2 = scalar_lea.vmem %s184_s9, 128  ;;  %p245_p1 = scmp.lt.s32.totalorder %s184_s9, %s184_s9 }
   0x8   :  { %p241_p0 = scmp.ne.s32.totalorder %s184_s9, %s240_s2  ;;  %p246_p2 = scmp.lt.s32.totalorder %s240_s2, %s240_s2 }
   0x9   :  { %214 = vmatmul.mubr.msk.bf16.vlgmr.msra.gmra.mxu0 %vm47_vm1, %v23_v4  ;;  %220 = vmatpush3.bf16.msra.mxu1 %v235_v6 }
   0xa   :  { %221 = vmatprep.subr.bf16.mxu1 %v262_v1  ;;  %p247_p3 = por %p246_p2, %p245_p1 }
   0xc   :  { %p248_p4 = pnand %p247_p3, %p241_p0 }
   0xd   :  { %222 = vmatpush3.bf16.msra.mxu1 %v236_v7 }
   0xe   :  { %223 = vmatprep.subr.bf16.mxu1 %v262_v1 }
  0x11   :  { %224 = vmatpush3.bf16.msra.mxu1 %v237_v8 }
  0xc9   :  { %v85_v10 = vpop.f32.mrf.mxu0 }
  0xca   :  { %v86_v11 = vadd.f32 %v191_v9, %v85_v10 }
  0xcb   :  { %v215_v12 = vpop.f32.mrf.mxu0 }
  0xcc   :  { %238 = vtanh.f32 %v86_v11 }
  0xcd   :  { %v88_v13 = vpop.f32.mrf.mxu0 }
  0xcf   :  { %v216_v14 = vpop.f32.mrf.mxu0 }
  0xd9   :  { %v239_v15 = vpop.eup %238 }
  0xda   :  { %v92_v16 = vpack.c.bf16 %v239_v15, %v239_v15 }
  0xdc   :  { %226 = vmatmul.mubr.msk.bf16.vlgmr.msra.gmra.mxu1 %vm132_vm2, %v92_v16 }
 0x19c   :  { %v170_v18 = vpop.f32.mrf.mxu1 }
 0x19d   :  { %v171_v19 = vadd.f32 %v195_v17, %v170_v18 }
 0x19e   :  { %v227_v20 = vpop.f32.mrf.mxu1 }
 0x19f   :  { %176 = vst.msk [vmem:[#allocation2] sm:$0xff] %vm47_vm1, %v171_v19 }
 0x1a0   :  { %v173_v21 = vpop.f32.mrf.mxu1 }
 0x1a1   :  { %251 = shalt.err (!%p248_p4)
}
 0x1a2   :  { %186 = dma.vmem_to_hbm [thread:$0]  %s184_s9, 128, %s332_s5, [#allocation3]   ;;  %v228_v22 = vpop.f32.mrf.mxu1 }
 0x1a3   :  { %260 = dma.done.wait [#allocation3], 128  }
 0x1a4   :  { %261 = vsyncadd [#allocation3], 4294967168 }
 0x1a5   :  { %190 = vsyncpa [#allocation3], 1 }

</bundles_post_ra>
